<compile_context>
chip_gen: v5e
topology: v5e:2x2
jax: 0.10.0
libtpu: 0.0.40
codegen_flags: <defaults>
</compile_context>

<pallas_src>
import jax
import jax.numpy as jnp
from jax.experimental import pallas as pl
from jax.experimental.pallas import tpu as pltpu

HIDDEN1 = 74
HIDDEN2 = 79
H1_PAD = 128   # 74 -> 128 (lane-dense; exact: ReLU(0+0)=0, padded w2 rows are zero)
H2_PAD = 128   # 79 -> 128 (lane-dense; exact: tanh(0+0)=0, padded w3 rows are zero)


def _round_up(x: int, m: int) -> int:
    return ((x + m - 1) // m) * m


def _cdiv(a: int, b: int) -> int:
    return (a + b - 1) // b


def _bf16_act_ok() -> bool:
    """bf16 VPU/EUP exists on v6e/v7x; keep f32 activations elsewhere (e.g. v5e)."""
    try:
        kind = jax.devices()[0].device_kind.lower()
    except Exception:
        return False
    return ("v6" in kind) or ("v7" in kind)


def _make_kernel(compute_dtype, act_dtype, precision):
    """Fused (x@W1+b1).relu() @ W2+b2 -> tanh -> @W3+b3 on one batch tile."""

    def kernel(x_ref, w1_ref, b1_ref, w2_ref, b2_ref, w3_ref, b3_ref, o_ref):
        x = x_ref[...].astype(compute_dtype)            # cast in-kernel (no wrapper pass)

        h1 = jnp.dot(x, w1_ref[...], preferred_element_type=jnp.float32,
                     precision=precision)
        h1 = jnp.maximum(h1.astype(act_dtype) + b1_ref[...], 0.0)     # ReLU (VPU)

        h2 = jnp.dot(h1.astype(compute_dtype), w2_ref[...],
                     preferred_element_type=jnp.float32, precision=precision)
        h2 = jnp.tanh(h2.astype(act_dtype) + b2_ref[...])             # Tanh (EUP)

        h3 = jnp.dot(h2.astype(compute_dtype), w3_ref[...],
                     preferred_element_type=jnp.float32, precision=precision)
        o_ref[...] = (h3 + b3_ref[...]).astype(o_ref.dtype)

    return kernel


def prepare_params(params, *, compute_dtype=jnp.bfloat16, act_dtype=None):
    """Pad/cast the constant weights ONCE (call at init, reuse every forward)."""
    if act_dtype is None:
        act_dtype = jnp.bfloat16 if (compute_dtype == jnp.bfloat16
                                     and _bf16_act_ok()) else jnp.float32
    input_dim = params["w1"].shape[0]
    output_dim = params["w3"].shape[1]
    weights = {
        # K (input_dim) is NOT padded; only hidden lane dims are padded to 128.
        "w1": jnp.pad(params["w1"], ((0, 0), (0, H1_PAD - HIDDEN1))).astype(compute_dtype),
        "b1": jnp.pad(params["b1"], ((0, 0), (0, H1_PAD - HIDDEN1))).astype(act_dtype),
        "w2": jnp.pad(params["w2"], ((0, H1_PAD - HIDDEN1),
                                     (0, H2_PAD - HIDDEN2))).astype(compute_dtype),
        "b2": jnp.pad(params["b2"], ((0, 0), (0, H2_PAD - HIDDEN2))).astype(act_dtype),
        "w3": jnp.pad(params["w3"], ((0, H2_PAD - HIDDEN2), (0, 0))).astype(compute_dtype),
        "b3": params["b3"].astype(jnp.float32),          # final bias add stays f32
    }
    return {
        "weights": weights,
        "compute_dtype": compute_dtype,
        "act_dtype": act_dtype,
        "input_dim": input_dim,
        "output_dim": output_dim,
    }


def _pick_tile(B: int, block_m: int):
    """Batch tile: multiple of 8, minimal padding, >=2 tiles when possible (v7x 2 TCs)."""
    b8 = _round_up(max(B, 1), 8)
    n = max(1, _cdiv(b8, block_m))      # minimum tile count under the block_m cap
    if b8 >= 16:
        n = max(n, 2)                   # keep both TensorCores busy on v7x
    tm = _round_up(_cdiv(b8, n), 8)
    grid = _cdiv(B, tm)                 # last tile may be partial (OOB writes dropped)
    return tm, grid


def pose_ffnn_forward(x, prepared, *, block_m=2048):
    """x: (B, input_dim) f32.  prepared: output of prepare_params()."""
    B, input_dim = x.shape
    assert input_dim == prepared["input_dim"]
    output_dim = prepared["output_dim"]
    compute_dtype = prepared["compute_dtype"]
    act_dtype = prepared["act_dtype"]
    w = prepared["weights"]

    tm, n_tiles = _pick_tile(B, block_m)

    precision = (None if compute_dtype == jnp.bfloat16
                 else jax.lax.Precision.HIGHEST)
    kernel = _make_kernel(compute_dtype, act_dtype, precision)

    weight_bytes = sum(int(a.size) * a.dtype.itemsize for a in w.values())
    # Double-buffered x/out tiles + f32 intermediates + resident weights.
    est_vmem = (2 * tm * input_dim * x.dtype.itemsize
                + 2 * tm * output_dim * 4
                + 3 * tm * H2_PAD * 4
                + 2 * weight_bytes)
    vmem_limit = min(32 * 1024 * 1024, max(16 * 1024 * 1024, est_vmem + (4 << 20)))

    cost = pl.CostEstimate(
        flops=2 * B * (input_dim * H1_PAD + H1_PAD * H2_PAD + H2_PAD * output_dim),
        transcendentals=B * H2_PAD,
        bytes_accessed=int(x.size) * x.dtype.itemsize
        + B * output_dim * 4 + int(weight_bytes),
    )

    out = pl.pallas_call(
        kernel,
        out_shape=jax.ShapeDtypeStruct((B, output_dim), jnp.float32),
        grid_spec=pltpu.PrefetchScalarGridSpec(
            num_scalar_prefetch=0,
            grid=(n_tiles,),
            in_specs=[
                pl.BlockSpec((tm, input_dim), lambda i: (i, 0)),       # x: streamed tiles
                pl.BlockSpec((input_dim, H1_PAD), lambda i: (0, 0)),   # w1: VMEM-resident
                pl.BlockSpec((1, H1_PAD), lambda i: (0, 0)),           # b1
                pl.BlockSpec((H1_PAD, H2_PAD), lambda i: (0, 0)),      # w2
                pl.BlockSpec((1, H2_PAD), lambda i: (0, 0)),           # b2
                pl.BlockSpec((H2_PAD, output_dim), lambda i: (0, 0)),  # w3
                pl.BlockSpec((1, output_dim), lambda i: (0, 0)),       # b3
            ],
            out_specs=pl.BlockSpec((tm, output_dim), lambda i: (i, 0)),
        ),
        compiler_params=pltpu.CompilerParams(
            dimension_semantics=("parallel",),       # megacore-shard batch tiles
            vmem_limit_bytes=int(vmem_limit),
        ),
        cost_estimate=cost,
    )(x, w["w1"], w["b1"], w["w2"], w["b2"], w["w3"], w["b3"])

    return out


def init_params(key, input_dim, output_dim):
    """Deterministic init mimicking PyTorch nn.Linear default (U[-1/sqrt(fan_in), +])."""
    dims = [(input_dim, HIDDEN1), (HIDDEN1, HIDDEN2), (HIDDEN2, output_dim)]
    params = {}
    for i, (fan_in, fan_out) in enumerate(dims, start=1):
        key, kw, kb = jax.random.split(key, 3)
        bound = 1.0 / jnp.sqrt(jnp.float32(fan_in))
        # stored already transposed to (in, out) for the kernel
        params[f"w{i}"] = jax.random.uniform(
            kw, (fan_in, fan_out), jnp.float32, -bound, bound)
        params[f"b{i}"] = jax.random.uniform(
            kb, (1, fan_out), jnp.float32, -bound, bound)
    return params


def reference_forward(x, params):
    h1 = jnp.maximum(x @ params["w1"] + params["b1"], 0.0)
    h2 = jnp.tanh(h1 @ params["w2"] + params["b2"])
    return h2 @ params["w3"] + params["b3"]


if __name__ == "__main__":
    key = jax.random.PRNGKey(0)
    k_x, k_x2, k_p = jax.random.split(key, 3)

    input_dim, output_dim = 32, 16
    params = init_params(k_p, input_dim, output_dim)

    # --- small batch, exact f32 path -----------------------------------------
    batch = 8
    x = jax.random.normal(k_x, (batch, input_dim), jnp.float32)
    ref = reference_forward(x, params)

    prep_f32 = prepare_params(params, compute_dtype=jnp.float32)
    out_f32 = jax.block_until_ready(pose_ffnn_forward(x, prep_f32))
    assert out_f32.shape == (batch, output_dim)
    assert jnp.allclose(out_f32, ref, atol=1e-4, rtol=1e-4)

    # --- same inputs, default bf16-operand / f32-accumulate path -------------
    prep_bf16 = prepare_params(params)          # padded/cast once, reused below
    out_bf16 = jax.block_until_ready(pose_ffnn_forward(x, prep_bf16))
    assert out_bf16.shape == (batch, output_dim)
    assert jnp.allclose(out_bf16, ref, atol=5e-2, rtol=5e-2)

    # --- larger, non-tile-aligned batch: multi-tile grid + partial edge tile --
    batch2 = 300
    x2 = jax.random.normal(k_x2, (batch2, input_dim), jnp.float32)
    ref2 = reference_forward(x2, params)
    out2 = jax.block_until_ready(
        pose_ffnn_forward(x2, prep_bf16, block_m=128))   # grid = (3,)
    assert out2.shape == (batch2, output_dim)
    assert jnp.allclose(out2, ref2, atol=5e-2, rtol=5e-2)

    print("KERNEL_OK")
</pallas_src>

<mosaic_0001>
module attributes {stable_mosaic.version = 11 : i64} {
  func.func @kernel(%arg0: i32, %arg1: memref<8x32xf32, #tpu.memory_space<vmem>>, %arg2: memref<32x128xf32, #tpu.memory_space<vmem>>, %arg3: memref<1x128xf32, #tpu.memory_space<vmem>>, %arg4: memref<128x128xf32, #tpu.memory_space<vmem>>, %arg5: memref<1x128xf32, #tpu.memory_space<vmem>>, %arg6: memref<128x16xf32, #tpu.memory_space<vmem>>, %arg7: memref<1x16xf32, #tpu.memory_space<vmem>>, %arg8: memref<8x16xf32, #tpu.memory_space<vmem>>) attributes {dimension_semantics = [#tpu.dimension_semantics<parallel>], iteration_bounds = array<i64: 1>, scalar_prefetch = 0 : i64, scratch_operands = 0 : i64, tpu.core_type = #tpu.core_type<tc>, window_params = [{transform_indices = @transform_0, window_bounds = array<i64: 8, 32>}, {pipeline_mode = #tpu.pipeline_mode<synchronous>, transform_indices = @transform_1, window_bounds = array<i64: 32, 128>}, {pipeline_mode = #tpu.pipeline_mode<synchronous>, transform_indices = @transform_2, window_bounds = array<i64: 1, 128>}, {pipeline_mode = #tpu.pipeline_mode<synchronous>, transform_indices = @transform_3, window_bounds = array<i64: 128, 128>}, {pipeline_mode = #tpu.pipeline_mode<synchronous>, transform_indices = @transform_4, window_bounds = array<i64: 1, 128>}, {pipeline_mode = #tpu.pipeline_mode<synchronous>, transform_indices = @transform_5, window_bounds = array<i64: 128, 16>}, {pipeline_mode = #tpu.pipeline_mode<synchronous>, transform_indices = @transform_6, window_bounds = array<i64: 1, 16>}, {transform_indices = @transform_7, window_bounds = array<i64: 8, 16>}]} {
    %c0 = arith.constant 0 : index
    %c0_0 = arith.constant 0 : index
    %0 = vector.load %arg1[%c0, %c0_0] : memref<8x32xf32, #tpu.memory_space<vmem>>, vector<8x32xf32>
    %c0_1 = arith.constant 0 : index
    %c0_2 = arith.constant 0 : index
    %1 = vector.load %arg2[%c0_1, %c0_2] : memref<32x128xf32, #tpu.memory_space<vmem>>, vector<32x128xf32>
    %cst = arith.constant dense<0.000000e+00> : vector<8x128xf32>
    %2 = tpu.matmul %0, %1, %cst {dimension_numbers = #tpu.dot_dimension_numbers<[1], [0], [0], [1], [0, 0, 1, 1], [], []>, precision = #tpu.contract_precision<fp32>} : vector<8x32xf32>, vector<32x128xf32>, vector<8x128xf32> -> vector<8x128xf32>
    %c0_3 = arith.constant 0 : index
    %c0_4 = arith.constant 0 : index
    %3 = vector.load %arg3[%c0_3, %c0_4] : memref<1x128xf32, #tpu.memory_space<vmem>>, vector<1x128xf32>
    %4 = vector.broadcast %3 : vector<1x128xf32> to vector<8x128xf32>
    %5 = arith.addf %2, %4 : vector<8x128xf32>
    %cst_5 = arith.constant 0.000000e+00 : f32
    %6 = vector.broadcast %cst_5 : f32 to vector<8x128xf32>
    %7 = arith.maximumf %5, %6 : vector<8x128xf32>
    %c0_6 = arith.constant 0 : index
    %c0_7 = arith.constant 0 : index
    %8 = vector.load %arg4[%c0_6, %c0_7] : memref<128x128xf32, #tpu.memory_space<vmem>>, vector<128x128xf32>
    %cst_8 = arith.constant dense<0.000000e+00> : vector<8x128xf32>
    %9 = tpu.matmul %7, %8, %cst_8 {dimension_numbers = #tpu.dot_dimension_numbers<[1], [0], [0], [1], [0, 0, 1, 1], [], []>, precision = #tpu.contract_precision<fp32>} : vector<8x128xf32>, vector<128x128xf32>, vector<8x128xf32> -> vector<8x128xf32>
    %c0_9 = arith.constant 0 : index
    %c0_10 = arith.constant 0 : index
    %10 = vector.load %arg5[%c0_9, %c0_10] : memref<1x128xf32, #tpu.memory_space<vmem>>, vector<1x128xf32>
    %11 = vector.broadcast %10 : vector<1x128xf32> to vector<8x128xf32>
    %12 = arith.addf %9, %11 : vector<8x128xf32>
    %13 = math.tanh %12 : vector<8x128xf32>
    %c0_11 = arith.constant 0 : index
    %c0_12 = arith.constant 0 : index
    %14 = vector.load %arg6[%c0_11, %c0_12] : memref<128x16xf32, #tpu.memory_space<vmem>>, vector<128x16xf32>
    %cst_13 = arith.constant dense<0.000000e+00> : vector<8x16xf32>
    %15 = tpu.matmul %13, %14, %cst_13 {dimension_numbers = #tpu.dot_dimension_numbers<[1], [0], [0], [1], [0, 0, 1, 1], [], []>, precision = #tpu.contract_precision<fp32>} : vector<8x128xf32>, vector<128x16xf32>, vector<8x16xf32> -> vector<8x16xf32>
    %c0_14 = arith.constant 0 : index
    %c0_15 = arith.constant 0 : index
    %16 = vector.load %arg7[%c0_14, %c0_15] : memref<1x16xf32, #tpu.memory_space<vmem>>, vector<1x16xf32>
    %17 = vector.broadcast %16 : vector<1x16xf32> to vector<8x16xf32>
    %18 = arith.addf %15, %17 : vector<8x16xf32>
    %c0_16 = arith.constant 0 : index
    %c0_17 = arith.constant 0 : index
    %19 = vector.load %arg8[%c0_16, %c0_17] : memref<8x16xf32, #tpu.memory_space<vmem>>, vector<8x16xf32>
    tpu.vector_store %arg8[%c0_16, %c0_17], %18 {strides = array<i32>} : memref<8x16xf32, #tpu.memory_space<vmem>>, vector<8x16xf32>,
    return
  }
  func.func @transform_0(%arg0: i32) -> (i32, i32) {
    %c0_i32 = arith.constant 0 : i32
    %c0_i32_0 = arith.constant 0 : i32
    return %arg0, %c0_i32 : i32, i32
  }
  func.func @transform_1(%arg0: i32) -> (i32, i32) {
    %c0_i32 = arith.constant 0 : i32
    %c0_i32_0 = arith.constant 0 : i32
    %c0_i32_1 = arith.constant 0 : i32
    return %c0_i32, %c0_i32_0 : i32, i32
  }
  func.func @transform_2(%arg0: i32) -> (i32, i32) {
    %c0_i32 = arith.constant 0 : i32
    %c0_i32_0 = arith.constant 0 : i32
    %c0_i32_1 = arith.constant 0 : i32
    return %c0_i32, %c0_i32_0 : i32, i32
  }
  func.func @transform_3(%arg0: i32) -> (i32, i32) {
    %c0_i32 = arith.constant 0 : i32
    %c0_i32_0 = arith.constant 0 : i32
    %c0_i32_1 = arith.constant 0 : i32
    return %c0_i32, %c0_i32_0 : i32, i32
  }
  func.func @transform_4(%arg0: i32) -> (i32, i32) {
    %c0_i32 = arith.constant 0 : i32
    %c0_i32_0 = arith.constant 0 : i32
    %c0_i32_1 = arith.constant 0 : i32
    return %c0_i32, %c0_i32_0 : i32, i32
  }
  func.func @transform_5(%arg0: i32) -> (i32, i32) {
    %c0_i32 = arith.constant 0 : i32
    %c0_i32_0 = arith.constant 0 : i32
    %c0_i32_1 = arith.constant 0 : i32
    return %c0_i32, %c0_i32_0 : i32, i32
  }
  func.func @transform_6(%arg0: i32) -> (i32, i32) {
    %c0_i32 = arith.constant 0 : i32
    %c0_i32_0 = arith.constant 0 : i32
    %c0_i32_1 = arith.constant 0 : i32
    return %c0_i32, %c0_i32_0 : i32, i32
  }
  func.func @transform_7(%arg0: i32) -> (i32, i32) {
    %c0_i32 = arith.constant 0 : i32
    %c0_i32_0 = arith.constant 0 : i32
    return %arg0, %c0_i32 : i32, i32
  }
}

</mosaic_0001>

<bundles_post_ra>
// kernel: tpu_custom_call.1
= control target key start
LH: loop header
LB: loop body
LE: loop exit
PB: predicated region body
PF: predicated region fallthrough
CT: control target
= control target key end

     0   :  { %12 = vsyncpa [#allocation3], 0  ;;  %s1689_s0 = inlined_call_operand.vmem [shape: f32[8,32], index: 0, kind: input, shape index: {}]   ;;  %s1690_s1 = inlined_call_operand.hbm [shape: f32[32,128], index: 1, kind: input, shape index: {}]   ;;  %s1691_s2 = inlined_call_operand.vmem [shape: f32[1,128], index: 2, kind: input, shape index: {}]   ;;  %s1692_s3 = inlined_call_operand.vmem [shape: f32[128,128], index: 3, kind: input, shape index: {}]   ;;  %s1693_s4 = inlined_call_operand.vmem [shape: f32[1,128], index: 4, kind: input, shape index: {}]   ;;  %s1694_s5 = inlined_call_operand.vmem [shape: f32[128,16], index: 5, kind: input, shape index: {}]   ;;  %s1695_s6 = inlined_call_operand.vmem [shape: f32[1,16], index: 6, kind: input, shape index: {}]   ;;  %s1696_s7 = inlined_call_operand.hbm [shape: f32[8,16], index: 7, kind: output, shape index: {}]  }
   0x1   :  { %13 = vsyncpa [#allocation4], 0  ;;  %s20_s26 = sshll.u32 %s1690_s1, 4  ;;  %s1045_s27 = smov [#allocation2]   ;;  %s21_s26 = int_to_ptr.hbm [resolvable:$true] %s20_s26 }
   0x2   :  { %s22_s28 = sshll.u32 %s1045_s27, 4  ;;  %s1046_s29 = smov 128   ;;  %s23_s28 = int_to_ptr.vmem [resolvable:$true] %s22_s28 }
   0x3   :  { %s1047_s30 = smov 8  }
   0x4   :  { %28 = dma.hbm_to_vmem [thread:$0]  %s21_s26, 512, %s23_s28, [#allocation3], %s1046_s29, %s1046_s29, %s1047_s30  }
   0x5   :  { %1041 = dma.done.wait [#allocation3], 512  }
   0x6   :  { %1042 = vsyncadd [#allocation3], 4294966784  ;;  %vm52_vm0 = vcmask 261120   ;;  %v47_v0 = vld [vmem:[#allocation2 + $0x18] sm:$0xff]  ;;  %v46_v1 = vld [vmem:[#allocation2 + $0x10] sm:$0xff]  ;;  %s1048_s22 = smov [#allocation5]  }
   0x7   :  { %v45_v2 = vld [vmem:[#allocation2 + $0x8] sm:$0xff]  ;;  %v1092_v3 = vand.u32 4294901760, %v47_v0  ;;  %v1094_v4 = vand.u32 4294901760, %v46_v1  ;;  %v44_v6 = vld [vmem:[#allocation2] sm:$0xff]  ;;  %v257_v8 = vld [vmem:[%s1692_s3 + $0x78] sm:$0xff]  ;;  %s972_s23 = sshll.u32 %s1048_s22, 4  ;;  %s973_s23 = int_to_ptr.vmem [resolvable:$true] %s972_s23 }
   0x8   :  { %v1096_v5 = vand.u32 4294901760, %v45_v2  ;;  %v43_v7 = vld [vmem:[%s1689_s0] sm:$0xff]  ;;  %v1104_v9 = vand.u32 4294901760, %v44_v6  ;;  %v1106_v11 = vand.u32 4294901760, %v257_v8  ;;  %v256_v12 = vld [vmem:[%s1692_s3 + $0x70] sm:$0xff]  ;;  %v255_v13 = vld [vmem:[%s1692_s3 + $0x68] sm:$0xff] }
   0x9   :  { %v54_v10 = vsel %vm52_vm0, %v43_v7, 0  ;;  %v98_v14 = vsub.f32 %v47_v0, %v1092_v3  ;;  %69 = vmatpush.msra.mxu0 %v1092_v3  ;;  %v1117_v15 = vsub.f32 %v46_v1, %v1094_v4  ;;  %169 = vmatpush.msra.mxu3 %v1092_v3  ;;  %v1131_v20 = vand.u32 4294901760, %v256_v12  ;;  %v254_v38 = vld [vmem:[%s1692_s3 + $0x60] sm:$0xff]  ;;  %v253_v39 = vld [vmem:[%s1692_s3 + $0x58] sm:$0xff]  ;;  %v252_v40 = vld [vmem:[%s1692_s3 + $0x50] sm:$0xff]  ;;  %s974_s26 = sshll.u32 %s1696_s7, 4  ;;  %s975_s26 = int_to_ptr.hbm [resolvable:$true] %s974_s26 }
   0xa   :  { %v1121_v16 = vsub.f32 %v45_v2, %v1096_v5  ;;  %v1123_v17 = vand.u32 4294901760, %v54_v10  ;;  %v1126_v18 = vsub.f32 %v44_v6, %v1104_v9  ;;  %v1129_v19 = vsub.f32 %v257_v8, %v1106_v11  ;;  %v251_v44 = vld [vmem:[%s1692_s3 + $0x48] sm:$0xff]  ;;  %v250_v45 = vld [vmem:[%s1692_s3 + $0x40] sm:$0xff]  ;;  %v249_v50 = vld [vmem:[%s1692_s3 + $0x38] sm:$0xff] }
   0xb   :  { %v1133_v21 = vand.u32 4294901760, %v255_v13  ;;  %140 = vmatpush.msra.mxu2 %v98_v14  ;;  %71 = vmatpush.msra.mxu0 %v1094_v4  ;;  %v99_v22 = vand.u32 4294901760, %v98_v14  ;;  %v105_v23 = vand.u32 4294901760, %v1117_v15  ;;  %v1143_v28 = vsub.f32 %v256_v12, %v1131_v20  ;;  %v248_v55 = vld [vmem:[%s1692_s3 + $0x30] sm:$0xff]  ;;  %v247_v60 = vld [vmem:[%s1692_s3 + $0x28] sm:$0xff] }
   0xc   :  { %v77_v24 = vsub.f32 %v54_v10, %v1123_v17  ;;  %v111_v25 = vand.u32 4294901760, %v1121_v16  ;;  %171 = vmatpush.msra.mxu3 %v1094_v4  ;;  %v117_v26 = vand.u32 4294901760, %v1126_v18  ;;  %v305_v27 = vand.u32 4294901760, %v1129_v19 }
   0xd   :  { %v1146_v29 = vsub.f32 %v255_v13, %v1133_v21  ;;  %143 = vmatpush.msra.mxu2 %v1117_v15  ;;  %v100_v30 = vsub.f32 %v98_v14, %v99_v22  ;;  %73 = vmatpush.msra.mxu0 %v1096_v5  ;;  %v106_v31 = vsub.f32 %v1117_v15, %v105_v23  ;;  %v311_v36 = vand.u32 4294901760, %v1143_v28 }
   0xe   :  { %v112_v32 = vsub.f32 %v1121_v16, %v111_v25  ;;  %v78_v33 = vand.u32 4294901760, %v77_v24  ;;  %173 = vmatpush.msra.mxu3 %v1096_v5  ;;  %v118_v34 = vsub.f32 %v1126_v18, %v117_v26  ;;  %v306_v35 = vsub.f32 %v1129_v19, %v305_v27 }
   0xf   :  { %v317_v37 = vand.u32 4294901760, %v1146_v29  ;;  %v101_v41 = vand.u32 4294901760, %v100_v30  ;;  %146 = vmatpush.msra.mxu2 %v1121_v16  ;;  %v107_v42 = vand.u32 4294901760, %v106_v31  ;;  %75 = vmatpush.msra.mxu0 %v1104_v9  ;;  %v312_v48 = vsub.f32 %v1143_v28, %v311_v36  ;;  %v246_v30 = vld [vmem:[%s1692_s3 + $0x20] sm:$0xff]  ;;  %v245_v31 = vld [vmem:[%s1692_s3 + $0x18] sm:$0xff] }
  0x10   :  { %v79_v43 = vsub.f32 %v77_v24, %v78_v33  ;;  %v113_v46 = vand.u32 4294901760, %v112_v32  ;;  %175 = vmatpush.msra.mxu3 %v1104_v9  ;;  %v307_v47 = vand.u32 4294901760, %v306_v35  ;;  %v1191_v52 = vand.u32 4294901760, %v254_v38  ;;  %v244_v32 = vld [vmem:[%s1692_s3 + $0x10] sm:$0xff] }
  0x11   :  { %198 = vmatpush.msrb.mxu0 %v99_v22  ;;  %v318_v49 = vsub.f32 %v1146_v29, %v317_v37  ;;  %102 = vmatpush.msra.mxu1 %v101_v41  ;;  %v1193_v53 = vand.u32 4294901760, %v253_v39  ;;  %v1195_v54 = vand.u32 4294901760, %v252_v40  ;;  %v119_v56 = vand.u32 4294901760, %v118_v34 }
  0x12   :  { %149 = vmatpush.msra.mxu2 %v1126_v18  ;;  %v80_v51 = vand.u32 4294901760, %v79_v43  ;;  %179 = vmatmul.f32.vlgmr.msra.gmra.mxu3 %v78_v33  ;;  %v313_v57 = vand.u32 4294901760, %v312_v48  ;;  %v1200_v58 = vand.u32 4294901760, %v251_v44  ;;  %v1202_v59 = vand.u32 4294901760, %v250_v45 }
  0x13   :  { %152 = vmatmul.f32.vlgmr.msra.gmra.mxu2 %v77_v24  ;;  %108 = vmatpush.msra.mxu1 %v107_v42  ;;  %v1208_v61 = vsub.f32 %v254_v38, %v1191_v52  ;;  %v1211_v62 = vsub.f32 %v253_v39, %v1193_v53  ;;  %v1214_v63 = vsub.f32 %v252_v40, %v1195_v54  ;;  %v1216_v0 = vand.u32 4294901760, %v249_v50  ;;  %v243_v40 = vld [vmem:[%s1692_s3 + $0x8] sm:$0xff] }
  0x14   :  { %81 = vmatmul.f32.vlgmr.msra.gmra.mxu0 %v80_v51  ;;  %308 = vmatpush.msrb.mxu3 %v307_v47  ;;  %v319_v1 = vand.u32 4294901760, %v318_v49  ;;  %v1219_v2 = vsub.f32 %v251_v44, %v1200_v58  ;;  %v1222_v6 = vsub.f32 %v250_v45, %v1202_v59  ;;  %v1224_v7 = vand.u32 4294901760, %v248_v55  ;;  %v242_v45 = vld [vmem:[%s1692_s3] sm:$0xff] }
  0x15   :  { %202 = vmatpush.msrb.mxu0 %v105_v23  ;;  %114 = vmatpush.msra.mxu1 %v113_v46  ;;  %v323_v8 = vand.u32 4294901760, %v1208_v61  ;;  %v329_v10 = vand.u32 4294901760, %v1211_v62  ;;  %v335_v12 = vand.u32 4294901760, %v1214_v63  ;;  %v1230_v13 = vand.u32 4294901760, %v247_v60 }
  0x16   :  { %263 = vmatpush.msrb.mxu2 %v1106_v11  ;;  %314 = vmatpush.msrb.mxu3 %v313_v57  ;;  %v341_v14 = vand.u32 4294901760, %v1219_v2  ;;  %v1236_v15 = vsub.f32 %v249_v50, %v1216_v0  ;;  %v347_v16 = vand.u32 4294901760, %v1222_v6  ;;  %v1279_v38 = vand.u32 4294901760, %v246_v30 }
  0x17   :  { %206 = vmatpush.msrb.mxu0 %v111_v25  ;;  %120 = vmatpush.msra.mxu1 %v119_v56  ;;  %v324_v22 = vsub.f32 %v1208_v61, %v323_v8  ;;  %v330_v23 = vsub.f32 %v1211_v62, %v329_v10  ;;  %v336_v24 = vsub.f32 %v1214_v63, %v335_v12  ;;  %v1281_v39 = vand.u32 4294901760, %v245_v31 }
  0x18   :  { %265 = vmatpush.msrb.mxu2 %v1131_v20  ;;  %122 = vmatmul.f32.vlgmr.msra.gmra.mxu1 %v1123_v17  ;;  %v1253_v25 = vsub.f32 %v248_v55, %v1224_v7  ;;  %v342_v34 = vsub.f32 %v1219_v2, %v341_v14  ;;  %v353_v35 = vand.u32 4294901760, %v1236_v15  ;;  %v1288_v42 = vand.u32 4294901760, %v244_v32 }
  0x19   :  { %210 = vmatpush.msrb.mxu0 %v117_v26  ;;  %229 = vmatpush.msrb.mxu1 %v1092_v3  ;;  %v325_v18 = vand.u32 4294901760, %v324_v22  ;;  %v1263_v26 = vsub.f32 %v247_v60, %v1230_v13  ;;  %v331_v33 = vand.u32 4294901760, %v330_v23  ;;  %v348_v3 = vsub.f32 %v1222_v6, %v347_v16 }
  0x1a   :  { %320 = vmatpush.msrb.mxu3 %v319_v1  ;;  %267 = vmatpush.msrb.mxu2 %v1133_v21  ;;  %v337_v41 = vand.u32 4294901760, %v336_v24  ;;  %v1293_v44 = vsub.f32 %v246_v30, %v1279_v38  ;;  %v343_v46 = vand.u32 4294901760, %v342_v34  ;;  %v354_v47 = vsub.f32 %v1236_v15, %v353_v35 }
  0x1b   :  { %406 = vmatpush.msra.mxu0 %v1129_v19  ;;  %231 = vmatpush.msrb.mxu1 %v1094_v4  ;;  %v359_v4 = vand.u32 4294901760, %v1253_v25  ;;  %v365_v43 = vand.u32 4294901760, %v1263_v26  ;;  %v1306_v48 = vand.u32 4294901760, %v243_v40  ;;  %v349_v49 = vand.u32 4294901760, %v348_v3 }
  0x1c   :  { %212 = vmatmul.f32.vlgmr.msrb.gmra.mxu0 %v1123_v17  ;;  %326 = vmatpush.msrb.mxu3 %v325_v18  ;;  %v371_v51 = vand.u32 4294901760, %v1293_v44  ;;  %v1316_v55 = vsub.f32 %v244_v32, %v1288_v42  ;;  %v1318_v56 = vand.u32 4294901760, %v242_v45  ;;  %vm965_vm1 = vcmask 130048  }
  0x1d   :  { %269 = vmatpush.msrb.mxu2 %v1191_v52  ;;  %233 = vmatpush.msrb.mxu1 %v1096_v5  ;;  %v1304_v5 = vsub.f32 %v245_v31, %v1281_v39  ;;  %v360_v50 = vsub.f32 %v1253_v25, %v359_v4  ;;  %v1327_v60 = vsub.f32 %v243_v40, %v1306_v48 }
  0x1e   :  { %409 = vmatpush.msra.mxu0 %v1143_v28  ;;  %332 = vmatpush.msrb.mxu3 %v331_v33  ;;  %v372_v22 = vsub.f32 %v1293_v44, %v371_v51  ;;  %v383_v23 = vand.u32 4294901760, %v1316_v55  ;;  %v1337_v24 = vsub.f32 %v242_v45, %v1318_v56  ;;  %v617_v28 = vld [vmem:[%s1694_s5 + $0x68] sm:$0xff] }
  0x1f   :  { %271 = vmatpush.msrb.mxu2 %v1193_v53  ;;  %235 = vmatpush.msrb.mxu1 %v1104_v9  ;;  %v355_v9 = vand.u32 4294901760, %v354_v47  ;;  %v377_v57 = vand.u32 4294901760, %v1304_v5  ;;  %v361_v1 = vand.u32 4294901760, %v360_v50  ;;  %v389_v18 = vand.u32 4294901760, %v1327_v60 }
  0x20   :  { %412 = vmatpush.msra.mxu0 %v1146_v29  ;;  %237 = vmatmul.f32.vlgmr.msrb.gmra.mxu1 %v1123_v17  ;;  %v366_v17 = vsub.f32 %v1263_v26, %v365_v43  ;;  %v373_v32 = vand.u32 4294901760, %v372_v22  ;;  %v384_v33 = vsub.f32 %v1316_v55, %v383_v23  ;;  %v395_v34 = vand.u32 4294901760, %v1337_v24 }
  0x21   :  { %338 = vmatpush.msrb.mxu3 %v337_v41  ;;  %273 = vmatpush.msrb.mxu2 %v1195_v54  ;;  %v378_v31 = vsub.f32 %v1304_v5, %v377_v57  ;;  %v390_v40 = vsub.f32 %v1327_v60, %v389_v18 }
  0x22   :  { %459 = vmatpush.msra.mxu1 %v1106_v11  ;;  %415 = vmatpush.msra.mxu0 %v1208_v61  ;;  %v367_v30 = vand.u32 4294901760, %v366_v17  ;;  %v385_v41 = vand.u32 4294901760, %v384_v33  ;;  %v396_v45 = vsub.f32 %v1337_v24, %v395_v34 }
  0x23   :  { %344 = vmatpush.msrb.mxu3 %v343_v46  ;;  %275 = vmatpush.msrb.mxu2 %v1200_v58  ;;  %v379_v3 = vand.u32 4294901760, %v378_v31  ;;  %v391_v46 = vand.u32 4294901760, %v390_v40 }
  0x24   :  { %461 = vmatpush.msra.mxu1 %v1131_v20  ;;  %418 = vmatpush.msra.mxu0 %v1211_v62  ;;  %v397_v47 = vand.u32 4294901760, %v396_v45 }
  0x25   :  { %350 = vmatpush.msrb.mxu3 %v349_v49  ;;  %277 = vmatpush.msrb.mxu2 %v1202_v59 }
  0x26   :  { %463 = vmatpush.msra.mxu1 %v1133_v21  ;;  %421 = vmatpush.msra.mxu0 %v1214_v63 }
  0x27   :  { %356 = vmatpush.msrb.mxu3 %v355_v9  ;;  %279 = vmatpush.msrb.mxu2 %v1216_v0 }
  0x28   :  { %465 = vmatpush.msra.mxu1 %v1191_v52  ;;  %424 = vmatpush.msra.mxu0 %v1219_v2  ;;  %v613_v2 = vld [vmem:[%s1694_s5 + $0x48] sm:$0xff] }
  0x29   :  { %362 = vmatpush.msrb.mxu3 %v361_v1  ;;  %281 = vmatpush.msrb.mxu2 %v1224_v7 }
  0x2a   :  { %467 = vmatpush.msra.mxu1 %v1193_v53  ;;  %427 = vmatpush.msra.mxu0 %v1222_v6 }
  0x2b   :  { %368 = vmatpush.msrb.mxu3 %v367_v30  ;;  %283 = vmatpush.msrb.mxu2 %v1230_v13 }
  0x2c   :  { %469 = vmatpush.msra.mxu1 %v1195_v54  ;;  %430 = vmatpush.msra.mxu0 %v1236_v15 }
  0x2d   :  { %374 = vmatpush.msrb.mxu3 %v373_v32  ;;  %285 = vmatpush.msrb.mxu2 %v1279_v38 }
  0x2e   :  { %471 = vmatpush.msra.mxu1 %v1200_v58  ;;  %433 = vmatpush.msra.mxu0 %v1253_v25 }
  0x2f   :  { %380 = vmatpush.msrb.mxu3 %v379_v3  ;;  %287 = vmatpush.msrb.mxu2 %v1281_v39 }
  0x30   :  { %473 = vmatpush.msra.mxu1 %v1202_v59  ;;  %436 = vmatpush.msra.mxu0 %v1263_v26 }
  0x31   :  { %386 = vmatpush.msrb.mxu3 %v385_v41  ;;  %289 = vmatpush.msrb.mxu2 %v1288_v42 }
  0x32   :  { %475 = vmatpush.msra.mxu1 %v1216_v0  ;;  %439 = vmatpush.msra.mxu0 %v1293_v44 }
  0x33   :  { %392 = vmatpush.msrb.mxu3 %v391_v46  ;;  %291 = vmatpush.msrb.mxu2 %v1306_v48 }
  0x34   :  { %477 = vmatpush.msra.mxu1 %v1224_v7  ;;  %442 = vmatpush.msra.mxu0 %v1304_v5 }
  0x35   :  { %398 = vmatpush.msrb.mxu3 %v397_v47  ;;  %293 = vmatpush.msrb.mxu2 %v1318_v56 }
  0x36   :  { %479 = vmatpush.msra.mxu1 %v1230_v13  ;;  %445 = vmatpush.msra.mxu0 %v1316_v55  ;;  %v611_v55 = vld [vmem:[%s1694_s5 + $0x38] sm:$0xff] }
  0x37   :  { %567 = vmatpush.msra.mxu3 %v1106_v11  ;;  %500 = vmatpush.msra.mxu2 %v305_v27  ;;  %v988_v11 = vld [vmem:[%s1691_s2] ss:$0 sm:$0xff]  ;;  %v618_v27 = vld [vmem:[%s1694_s5 + $0x70] sm:$0xff]  ;;  %v1533_v31 = vand.u32 4294901760, %v611_v55 }
  0x38   :  { %481 = vmatpush.msra.mxu1 %v1279_v38  ;;  %448 = vmatpush.msra.mxu0 %v1327_v60 }
  0x39   :  { %569 = vmatpush.msra.mxu3 %v1131_v20  ;;  %504 = vmatpush.msra.mxu2 %v311_v36  ;;  %v1544_v40 = vsub.f32 %v611_v55, %v1533_v31 }
  0x3a   :  { %483 = vmatpush.msra.mxu1 %v1281_v39  ;;  %451 = vmatpush.msra.mxu0 %v1337_v24 }
  0x3b   :  { %571 = vmatpush.msra.mxu3 %v1133_v21  ;;  %508 = vmatpush.msra.mxu2 %v317_v37  ;;  %v619_v21 = vld [vmem:[%s1694_s5 + $0x78] sm:$0xff] }
  0x3c   :  { %485 = vmatpush.msra.mxu1 %v1288_v42  ;;  %v1448_v37 = vand.u32 4294901760, %v619_v21 }
  0x3d   :  { %573 = vmatpush.msra.mxu3 %v1191_v52  ;;  %512 = vmatpush.msra.mxu2 %v323_v8  ;;  %v1450_v52 = vand.u32 4294901760, %v618_v27 }
  0x3e   :  { %487 = vmatpush.msra.mxu1 %v1306_v48  ;;  %625 = vmatpush.msrb.mxu0 %v1448_v37 }
  0x3f   :  { %575 = vmatpush.msra.mxu3 %v1193_v53  ;;  %516 = vmatpush.msra.mxu2 %v329_v10  ;;  %v1452_v53 = vand.u32 4294901760, %v617_v28  ;;  %v1476_v8 = vsub.f32 %v618_v27, %v1450_v52 }
  0x40   :  { %489 = vmatpush.msra.mxu1 %v1318_v56  ;;  %627 = vmatpush.msrb.mxu0 %v1450_v52 }
  0x41   :  { %577 = vmatpush.msra.mxu3 %v1195_v54  ;;  %520 = vmatpush.msra.mxu2 %v335_v12  ;;  %v616_v54 = vld [vmem:[%s1694_s5 + $0x60] sm:$0xff]  ;;  %v1479_v10 = vsub.f32 %v617_v28, %v1452_v53  ;;  %v1482_v12 = vand.u32 4294901760, %v613_v2 }
  0x42   :  { %v1463_v62 = vand.u32 4294901760, %v616_v54  ;;  %629 = vmatpush.msrb.mxu0 %v1452_v53 }
  0x43   :  { %579 = vmatpush.msra.mxu3 %v1200_v58  ;;  %524 = vmatpush.msra.mxu2 %v341_v14  ;;  %v615_v58 = vld [vmem:[%s1694_s5 + $0x58] sm:$0xff] }
  0x44   :  { %v1465_v63 = vand.u32 4294901760, %v615_v58  ;;  %v1485_v14 = vsub.f32 %v616_v54, %v1463_v62  ;;  %631 = vmatpush.msrb.mxu0 %v1463_v62 }
  0x45   :  { %581 = vmatpush.msra.mxu3 %v1202_v59  ;;  %528 = vmatpush.msra.mxu2 %v347_v16  ;;  %v614_v59 = vld [vmem:[%s1694_s5 + $0x50] sm:$0xff] }
  0x46   :  { %v1488_v15 = vsub.f32 %v615_v58, %v1465_v63  ;;  %633 = vmatpush.msrb.mxu0 %v1465_v63 }
  0x47   :  { %583 = vmatpush.msra.mxu3 %v1216_v0  ;;  %532 = vmatpush.msra.mxu2 %v353_v35  ;;  %v1467_v0 = vand.u32 4294901760, %v614_v59  ;;  %v673_v35 = vand.u32 4294901760, %v1476_v8 }
  0x49   :  { %585 = vmatpush.msra.mxu3 %v1224_v7  ;;  %536 = vmatpush.msra.mxu2 %v359_v4  ;;  %v1473_v7 = vsub.f32 %v619_v21, %v1448_v37  ;;  %v1491_v16 = vsub.f32 %v614_v59, %v1467_v0  ;;  %v685_v4 = vand.u32 4294901760, %v1485_v14  ;;  %v674_v5 = vsub.f32 %v1476_v8, %v673_v35 }
  0x4a   :  { %635 = vmatpush.msrb.mxu0 %v1467_v0 }
  0x4b   :  { %587 = vmatpush.msra.mxu3 %v1230_v13  ;;  %540 = vmatpush.msra.mxu2 %v365_v43  ;;  %v667_v26 = vand.u32 4294901760, %v1473_v7  ;;  %v1500_v43 = vsub.f32 %v613_v2, %v1482_v12  ;;  %v697_v50 = vand.u32 4294901760, %v1491_v16  ;;  %v686_v60 = vsub.f32 %v1485_v14, %v685_v4 }
  0x4c   :  { %637 = vmatpush.msrb.mxu0 %v1482_v12 }
  0x4d   :  { %589 = vmatpush.msra.mxu3 %v1279_v38  ;;  %544 = vmatpush.msra.mxu2 %v371_v51  ;;  %v679_v38 = vand.u32 4294901760, %v1479_v10  ;;  %v668_v44 = vsub.f32 %v1473_v7, %v667_v26  ;;  %v612_v51 = vld [vmem:[%s1694_s5 + $0x40] sm:$0xff]  ;;  %v698_v33 = vsub.f32 %v1491_v16, %v697_v50 }
  0x4e   :  { %v1530_v30 = vand.u32 4294901760, %v612_v51 }
  0x4f   :  { %591 = vmatpush.msra.mxu3 %v1281_v39  ;;  %548 = vmatpush.msra.mxu2 %v377_v57  ;;  %v669_v17 = vand.u32 4294901760, %v668_v44  ;;  %v675_v57 = vand.u32 4294901760, %v674_v5  ;;  %v699_v21 = vand.u32 4294901760, %v698_v33  ;;  %v608_v44 = vld [vmem:[%s1694_s5 + $0x20] sm:$0xff] }
  0x50   :  { %v1541_v3 = vsub.f32 %v612_v51, %v1530_v30  ;;  %639 = vmatpush.msrb.mxu0 %v1530_v30 }
  0x51   :  { %593 = vmatpush.msra.mxu3 %v1288_v42  ;;  %552 = vmatpush.msra.mxu2 %v383_v23  ;;  %v691_v42 = vand.u32 4294901760, %v1488_v15  ;;  %v703_v23 = vand.u32 4294901760, %v1500_v43 }
  0x52   :  { %670 = vmatpush.msrb.mxu1 %v669_v17  ;;  %641 = vmatpush.msrb.mxu0 %v1533_v31 }
  0x53   :  { %595 = vmatpush.msra.mxu3 %v1306_v48  ;;  %556 = vmatpush.msra.mxu2 %v389_v18  ;;  %v680_v48 = vsub.f32 %v1479_v10, %v679_v38  ;;  %v692_v22 = vsub.f32 %v1488_v15, %v691_v42  ;;  %v704_v47 = vsub.f32 %v1500_v43, %v703_v23 }
  0x54   :  { %676 = vmatpush.msrb.mxu1 %v675_v57 }
  0x55   :  { %597 = vmatpush.msra.mxu3 %v1318_v56  ;;  %560 = vmatpush.msra.mxu2 %v395_v34  ;;  %v610_v56 = vld [vmem:[%s1694_s5 + $0x30] sm:$0xff]  ;;  %v681_v24 = vand.u32 4294901760, %v680_v48  ;;  %v687_v34 = vand.u32 4294901760, %v686_v60  ;;  %v693_v46 = vand.u32 4294901760, %v692_v22  ;;  %v1600_v48 = vand.u32 4294901760, %v608_v44  ;;  %v605_v22 = vld [vmem:[%s1694_s5 + $0x8] sm:$0xff] }
  0x56   :  { %v1535_v18 = vand.u32 4294901760, %v610_v56 }
  0x57   :  { %682 = vmatpush.msrb.mxu1 %v681_v24  ;;  %v1609_v55 = vsub.f32 %v608_v44, %v1600_v48 }
  0x58   :  { %v1548_v41 = vsub.f32 %v610_v56, %v1535_v18  ;;  %643 = vmatpush.msrb.mxu0 %v1535_v18 }
  0x59   :  { %688 = vmatpush.msrb.mxu1 %v687_v34  ;;  %v733_v57 = vand.u32 4294901760, %v1609_v55 }
  0x5a   :  { %v721_v28 = vand.u32 4294901760, %v1548_v41 }
  0x5b   :  { %694 = vmatpush.msrb.mxu1 %v693_v46  ;;  %v604_v46 = vld [vmem:[%s1694_s5] sm:$0xff] }
  0x5d   :  { %700 = vmatpush.msrb.mxu1 %v699_v21 }
  0x91   :  { %v82_v19 = vpop.f32.mrf.mxu0 }
  0x92   :  { %v83_v20 = vadd.f32 %v988_v11, %v82_v19  ;;  %v709_v11 = vand.u32 4294901760, %v1541_v3  ;;  %v715_v19 = vand.u32 4294901760, %v1544_v40 }
  0x94   :  { %v710_v27 = vsub.f32 %v1541_v3, %v709_v11  ;;  %v716_v54 = vsub.f32 %v1544_v40, %v715_v19 }
  0x95   :  { %v123_v29 = vpop.f32.mrf.mxu1  ;;  %v180_v6 = vpop.f32.mrf.mxu3 }
  0x96   :  { %v153_v36 = vpop.f32.mrf.mxu2  ;;  %v124_v61 = vadd.f32 %v123_v29, %v83_v20  ;;  %v711_v59 = vand.u32 4294901760, %v710_v27  ;;  %v654_v27 = vand.u32 4294901760, %v604_v46 }
  0x98   :  { %v154_v13 = vadd.f32 %v153_v36, %v124_v61  ;;  %v705_v36 = vand.u32 4294901760, %v704_v47  ;;  %v722_v61 = vsub.f32 %v1548_v41, %v721_v28 }
  0x99   :  { %v213_v25 = vpop.f32.mrf.mxu0 }
  0x9a   :  { %v181_v39 = vadd.f32 %v180_v6, %v154_v13  ;;  %706 = vmatpush.msrb.mxu1 %v705_v36  ;;  %v717_v6 = vand.u32 4294901760, %v716_v54  ;;  %v723_v13 = vand.u32 4294901760, %v722_v61 }
  0x9c   :  { %v214_v49 = vadd.f32 %v213_v25, %v181_v39  ;;  %712 = vmatpush.msrb.mxu1 %v711_v59  ;;  %v609_v25 = vld [vmem:[%s1694_s5 + $0x28] sm:$0xff] }
  0x9d   :  { %v238_v9 = vpop.f32.mrf.mxu1  ;;  %v1592_v39 = vand.u32 4294901760, %v609_v25 }
  0x9e   :  { %v239_v1 = vadd.f32 %v238_v9, %v214_v49  ;;  %718 = vmatpush.msrb.mxu1 %v717_v6  ;;  %v607_v49 = vld [vmem:[%s1694_s5 + $0x18] sm:$0xff]  ;;  %v606_v9 = vld [vmem:[%s1694_s5 + $0x10] sm:$0xff] }
  0x9f   :  { %v1598_v5 = vsub.f32 %v609_v25, %v1592_v39  ;;  %645 = vmatpush.msrb.mxu0 %v1592_v39  ;;  %v1611_v56 = vand.u32 4294901760, %v607_v49 }
  0xa0   :  { %v241_v32 = vmax.f32 %v239_v1, 0.0  ;;  %724 = vmatpush.msrb.mxu1 %v723_v13  ;;  %v1626_v1 = vand.u32 4294901760, %v606_v9 }
  0xa1   :  { %v727_v51 = vand.u32 4294901760, %v1598_v5  ;;  %647 = vmatpush.msrb.mxu0 %v1600_v48  ;;  %v1624_v60 = vsub.f32 %v607_v49, %v1611_v56 }
  0xa2   :  { %v294_v45 = vand.u32 4294901760, %v241_v32  ;;  %v744_v34 = vsub.f32 %v606_v9, %v1626_v1 }
  0xa3   :  { %v728_v17 = vsub.f32 %v1598_v5, %v727_v51  ;;  %649 = vmatpush.msrb.mxu0 %v1611_v56  ;;  %v739_v33 = vand.u32 4294901760, %v1624_v60 }
  0xa4   :  { %v295_v20 = vsub.f32 %v241_v32, %v294_v45  ;;  %400 = vmatmul.f32.vlgmr.msrb.gmra.mxu3 %v294_v45  ;;  %v734_v32 = vsub.f32 %v1609_v55, %v733_v57  ;;  %v745_v21 = vand.u32 4294901760, %v744_v34 }
  0xa5   :  { %821 = vmatpush.msrb.mxu3 %v1448_v37  ;;  %v729_v24 = vand.u32 4294901760, %v728_v17  ;;  %651 = vmatpush.msrb.mxu0 %v1626_v1 }
  0xa6   :  { %454 = vmatmul.f32.vlgmr.msra.gmra.mxu0 %v295_v20  ;;  %v296_v29 = vand.u32 4294901760, %v295_v20  ;;  %v735_v47 = vand.u32 4294901760, %v734_v32  ;;  %v746_v54 = vsub.f32 %v744_v34, %v745_v21 }
  0xa7   :  { %823 = vmatpush.msrb.mxu3 %v1450_v52  ;;  %730 = vmatpush.msrb.mxu1 %v729_v24 }
  0xa8   :  { %493 = vmatmul.f32.vlgmr.msra.gmra.mxu1 %v296_v29  ;;  %v297_v58 = vsub.f32 %v295_v20, %v296_v29  ;;  %v740_v20 = vsub.f32 %v1624_v60, %v739_v33  ;;  %v747_v61 = vand.u32 4294901760, %v746_v54 }
  0xa9   :  { %825 = vmatpush.msrb.mxu3 %v1452_v53  ;;  %736 = vmatpush.msrb.mxu1 %v735_v47 }
  0xaa   :  { %v298_v2 = vand.u32 4294901760, %v297_v58  ;;  %v741_v36 = vand.u32 4294901760, %v740_v20  ;;  %v756_v58 = vsub.f32 %v604_v46, %v654_v27 }
  0xab   :  { %827 = vmatpush.msrb.mxu3 %v1463_v62 }
  0xac   :  { %299 = vmatmul.f32.vlgmr.msrb.gmra.mxu2 %v298_v2  ;;  %599 = vmatmul.f32.vlgmr.msra.gmra.mxu3 %v294_v45  ;;  %v757_v2 = vand.u32 4294901760, %v756_v58 }
  0xad   :  { %768 = vmatpush.msrb.mxu2 %v1473_v7  ;;  %829 = vmatpush.msrb.mxu3 %v1465_v63 }
  0xae   :  { %742 = vmatpush.msrb.mxu1 %v741_v36  ;;  %v758_v13 = vsub.f32 %v756_v58, %v757_v2 }
  0xaf   :  { %771 = vmatpush.msrb.mxu2 %v1476_v8  ;;  %831 = vmatpush.msrb.mxu3 %v1467_v0 }
  0xb0   :  { %748 = vmatpush.msrb.mxu1 %v747_v61  ;;  %v759_v44 = vand.u32 4294901760, %v758_v13 }
  0xb1   :  { %774 = vmatpush.msrb.mxu2 %v1479_v10  ;;  %833 = vmatpush.msrb.mxu3 %v1482_v12 }
  0xb3   :  { %777 = vmatpush.msrb.mxu2 %v1485_v14  ;;  %835 = vmatpush.msrb.mxu3 %v1530_v30 }
  0xb4   :  { %562 = vmatmul.f32.vlgmr.msra.gmra.mxu2 %v294_v45  ;;  %v652_v45 = vand.u32 4294901760, %v605_v22 }
  0xb5   :  { %780 = vmatpush.msrb.mxu2 %v1488_v15  ;;  %837 = vmatpush.msrb.mxu3 %v1533_v31 }
  0xb6   :  { %v750_v29 = vsub.f32 %v605_v22, %v652_v45  ;;  %653 = vmatpush.msrb.mxu0 %v652_v45 }
  0xb7   :  { %783 = vmatpush.msrb.mxu2 %v1491_v16  ;;  %839 = vmatpush.msrb.mxu3 %v1535_v18 }
  0xb8   :  { %v751_v59 = vand.u32 4294901760, %v750_v29  ;;  %655 = vmatpush.msrb.mxu0 %v654_v27 }
  0xb9   :  { %786 = vmatpush.msrb.mxu2 %v1500_v43  ;;  %841 = vmatpush.msrb.mxu3 %v1592_v39 }
  0xba   :  { %862 = vmatpush.msra.mxu0 %v667_v26  ;;  %v752_v6 = vsub.f32 %v750_v29, %v751_v59 }
  0xbb   :  { %789 = vmatpush.msrb.mxu2 %v1541_v3  ;;  %843 = vmatpush.msrb.mxu3 %v1600_v48 }
  0xbc   :  { %866 = vmatpush.msra.mxu0 %v673_v35  ;;  %v753_v25 = vand.u32 4294901760, %v752_v6 }
  0xbd   :  { %792 = vmatpush.msrb.mxu2 %v1544_v40  ;;  %845 = vmatpush.msrb.mxu3 %v1611_v56 }
  0xbe   :  { %870 = vmatpush.msra.mxu0 %v679_v38  ;;  %754 = vmatpush.msrb.mxu1 %v753_v25 }
  0xbf   :  { %795 = vmatpush.msrb.mxu2 %v1548_v41  ;;  %847 = vmatpush.msrb.mxu3 %v1626_v1 }
  0xc0   :  { %874 = vmatpush.msra.mxu0 %v685_v4  ;;  %760 = vmatpush.msrb.mxu1 %v759_v44 }
  0xc1   :  { %798 = vmatpush.msrb.mxu2 %v1598_v5  ;;  %849 = vmatpush.msrb.mxu3 %v652_v45 }
  0xc2   :  { %929 = vmatpush.msra.mxu1 %v1448_v37  ;;  %878 = vmatpush.msra.mxu0 %v691_v42  ;;  %v989_v37 = vld [vmem:[%s1693_s4] ss:$0 sm:$0xff] }
  0xc3   :  { %801 = vmatpush.msrb.mxu2 %v1609_v55  ;;  %851 = vmatpush.msrb.mxu3 %v654_v27 }
  0xc4   :  { %931 = vmatpush.msra.mxu1 %v1450_v52  ;;  %882 = vmatpush.msra.mxu0 %v697_v50  ;;  %v990_v50 = vld [vmem:[%s1695_s6] ss:$0 sm:$0xff] }
  0xc5   :  { %804 = vmatpush.msrb.mxu2 %v1624_v60 }
  0xc6   :  { %933 = vmatpush.msra.mxu1 %v1452_v53  ;;  %886 = vmatpush.msra.mxu0 %v703_v23 }
  0xc7   :  { %807 = vmatpush.msrb.mxu2 %v744_v34 }
  0xc8   :  { %935 = vmatpush.msra.mxu1 %v1463_v62  ;;  %890 = vmatpush.msra.mxu0 %v709_v11 }
  0xc9   :  { %810 = vmatpush.msrb.mxu2 %v750_v29 }
  0xca   :  { %937 = vmatpush.msra.mxu1 %v1465_v63  ;;  %894 = vmatpush.msra.mxu0 %v715_v19 }
  0xcb   :  { %813 = vmatpush.msrb.mxu2 %v756_v58 }
  0xcc   :  { %939 = vmatpush.msra.mxu1 %v1467_v0  ;;  %898 = vmatpush.msra.mxu0 %v721_v28 }
  0xce   :  { %941 = vmatpush.msra.mxu1 %v1482_v12  ;;  %902 = vmatpush.msra.mxu0 %v727_v51 }
  0xd0   :  { %943 = vmatpush.msra.mxu1 %v1530_v30  ;;  %906 = vmatpush.msra.mxu0 %v733_v57 }
  0xd2   :  { %945 = vmatpush.msra.mxu1 %v1533_v31  ;;  %910 = vmatpush.msra.mxu0 %v739_v33 }
  0xd4   :  { %947 = vmatpush.msra.mxu1 %v1535_v18  ;;  %914 = vmatpush.msra.mxu0 %v745_v21 }
  0xd6   :  { %949 = vmatpush.msra.mxu1 %v1592_v39  ;;  %918 = vmatpush.msra.mxu0 %v751_v59 }
  0xd8   :  { %951 = vmatpush.msra.mxu1 %v1600_v48  ;;  %922 = vmatpush.msra.mxu0 %v757_v2 }
  0xda   :  { %953 = vmatpush.msra.mxu1 %v1611_v56 }
  0xdc   :  { %955 = vmatpush.msra.mxu1 %v1626_v1 }
  0xde   :  { %957 = vmatpush.msra.mxu1 %v652_v45 }
  0xe0   :  { %959 = vmatpush.msra.mxu1 %v654_v27 }
 0x123   :  { %v455_v0 = vpop.f32.mrf.mxu0 }
 0x125   :  { %v494_v8 = vpop.f32.mrf.mxu1 }
 0x127   :  { %v401_v52 = vpop.f32.mrf.mxu3 }
 0x12f   :  { %v300_v53 = vpop.f32.mrf.mxu2  ;;  %v600_v15 = vpop.f32.mrf.mxu3 }
 0x130   :  { %v301_v62 = vadd.f32 %v989_v37, %v300_v53 }
 0x132   :  { %v402_v63 = vadd.f32 %v401_v52, %v301_v62 }
 0x134   :  { %v456_v7 = vadd.f32 %v455_v0, %v402_v63 }
 0x136   :  { %v495_v10 = vadd.f32 %v494_v8, %v456_v7 }
 0x137   :  { %v563_v12 = vpop.f32.mrf.mxu2 }
 0x138   :  { %v564_v14 = vadd.f32 %v563_v12, %v495_v10 }
 0x13a   :  { %v601_v16 = vadd.f32 %v600_v15, %v564_v14 }
 0x13c   :  { %991 = vtanh.f32 %v601_v16 }
 0x142   :  { %v992_v26 = vpop.eup %991 }
 0x143   :  { %v656_v35 = vand.u32 4294901760, %v992_v26 }
 0x145   :  { %762 = vmatmul.f32.vlgmr.msrb.gmra.mxu1 %v656_v35  ;;  %v657_v38 = vsub.f32 %v992_v26, %v656_v35 }
 0x147   :  { %816 = vmatmul.f32.vlgmr.msrb.gmra.mxu2 %v657_v38  ;;  %v658_v4 = vand.u32 4294901760, %v657_v38 }
 0x149   :  { %855 = vmatmul.f32.vlgmr.msrb.gmra.mxu3 %v658_v4  ;;  %v659_v42 = vsub.f32 %v657_v38, %v658_v4 }
 0x14b   :  { %v660_v43 = vand.u32 4294901760, %v659_v42 }
 0x14d   :  { %661 = vmatmul.f32.vlgmr.msrb.gmra.mxu0 %v660_v43  ;;  %961 = vmatmul.f32.vlgmr.msra.gmra.mxu1 %v656_v35 }
 0x155   :  { %924 = vmatmul.f32.vlgmr.msra.gmra.mxu0 %v656_v35 }
 0x1c2   :  { %v763_v23 = vpop.f32.mrf.mxu1 }
 0x1ca   :  { %v662_v30 = vpop.f32.mrf.mxu0  ;;  %v817_v3 = vpop.f32.mrf.mxu2 }
 0x1cb   :  { %v663_v31 = vadd.f32 %v990_v50, %v662_v30  ;;  %v962_v39 = vpop.f32.mrf.mxu1 }
 0x1cc   :  { %v856_v41 = vpop.f32.mrf.mxu3 }
 0x1cd   :  { %v764_v18 = vadd.f32 %v763_v23, %v663_v31 }
 0x1cf   :  { %v818_v40 = vadd.f32 %v817_v3, %v764_v18 }
 0x1d1   :  { %v857_v11 = vadd.f32 %v856_v41, %v818_v40 }
 0x1d2   :  { %v925_v19 = vpop.f32.mrf.mxu0 }
 0x1d3   :  { %v926_v28 = vadd.f32 %v925_v19, %v857_v11 }
 0x1d5   :  { %v963_v5 = vadd.f32 %v962_v39, %v926_v28 }
 0x1d7   :  { %966 = vst.msk [vmem:[#allocation5] sm:$0xff] %vm965_vm1, %v963_v5 }
 0x1d8   :  { %977 = dma.vmem_to_hbm [thread:$0]  %s973_s23, 128, %s975_s26, [#allocation4]  }
 0x1d9   :  { %1043 = dma.done.wait [#allocation4], 128  }
 0x1da   :  { %1044 = vsyncadd [#allocation4], 4294967168 }
 0x1db   :  { %982 = vsyncpa [#allocation3], 1 }
 0x1dc   :  { %983 = vsyncpa [#allocation4], 1 }

</bundles_post_ra>
